<compile_context>
chip_gen: v7x
topology: tpu7x:2x2x1
jax: 0.10.0
libtpu: 0.0.40
codegen_flags: <defaults>
</compile_context>

<pallas_src>
import numpy as np
import jax
import jax.numpy as jnp
from jax.experimental import pallas as pl
from jax.experimental.pallas import tpu as pltpu


# ----------------------------------------------------------------------------
# e3nn-style parameter setup (host-side numpy glue, not kernel work)
# ----------------------------------------------------------------------------

def wigner_3j(l1, l2, l3):
    """Real Wigner-3j tensors for l <= 1 (e3nn real basis, m = -l..l)."""
    if (l1, l2, l3) == (0, 0, 0):
        return np.ones((1, 1, 1), np.float64)
    if (l1, l2, l3) == (1, 1, 0):
        return np.eye(3)[:, :, None] / np.sqrt(3.0)
    if (l1, l2, l3) == (0, 1, 1):
        return np.eye(3)[None, :, :] / np.sqrt(3.0)
    if (l1, l2, l3) == (1, 0, 1):
        return np.eye(3)[:, None, :] / np.sqrt(3.0)
    if (l1, l2, l3) == (1, 1, 1):
        eps = np.zeros((3, 3, 3), np.float64)
        for i, j, k in [(0, 1, 2), (1, 2, 0), (2, 0, 1)]:
            eps[i, j, k] = 1.0
            eps[j, i, k] = -1.0
        return eps / np.sqrt(6.0)
    raise NotImplementedError((l1, l2, l3))  # TODO(synk): general-l wigner-3j


def irreps_dim(irreps):
    return sum(mul * (2 * l + 1) for mul, l, p in irreps)


def irreps_slices(irreps):
    slices, start = [], 0
    for mul, l, p in irreps:
        d = mul * (2 * l + 1)
        slices.append((start, start + d))
        start += d
    return slices


def build_fctp_swishgate_params(seed=0):
    """Builds folded TP weights + packed kernel weights for the synthetic module."""
    irreps_in1 = [(8, 0, 1), (8, 1, 1)]          # 8x0e + 8x1e
    irreps_in2 = [(1, 0, 1), (1, 1, 1)]          # 1x0e + 1x1e
    irreps_tp_out = [(16, 0, 1), (8, 1, 1)]      # gate.irreps_in = 16x0e + 8x1e
    n_scalars, n_gates, mul_gated, l_gated = 8, 8, 8, 1
    # fully-connected 'uvw' instructions (i_in1, i_in2, i_out) with ir_out in ir1*ir2
    instructions = [(0, 0, 0), (0, 1, 1), (1, 0, 1), (1, 1, 0), (1, 1, 1)]

    d1 = irreps_dim(irreps_in1)
    d2 = irreps_dim(irreps_in2)
    dtp = irreps_dim(irreps_tp_out)
    s1 = irreps_slices(irreps_in1)
    s2 = irreps_slices(irreps_in2)
    so = irreps_slices(irreps_tp_out)

    # e3nn internal weights: randn of shape (mul1, mul2, mul_out) per 'uvw' path.
    key = jax.random.PRNGKey(seed)
    weights = []
    for (i1, i2, io) in instructions:
        key, sub = jax.random.split(key)
        w = jax.random.normal(
            sub, (irreps_in1[i1][0], irreps_in2[i2][0], irreps_tp_out[io][0]),
            dtype=jnp.float32)
        weights.append(np.asarray(w, np.float64))

    # rescale: 1/sqrt(fan_in) per output slice, fan_in('uvw') = mul1 * mul2.
    fan_in = {}
    for (i1, i2, io) in instructions:
        fan_in[io] = fan_in.get(io, 0) + irreps_in1[i1][0] * irreps_in2[i2][0]
    sqrt_k = {io: 1.0 / np.sqrt(f) for io, f in fan_in.items()}

    # Fold (weights x wigner-3j x 'component' norm x rescale) into W3[b, a, o].
    w3 = np.zeros((d2, d1, dtp), np.float64)
    for (i1, i2, io), w in zip(instructions, weights):
        mul1, l1, _ = irreps_in1[i1]
        mul2, l2, _ = irreps_in2[i2]
        mulo, lo, _ = irreps_tp_out[io]
        cg = wigner_3j(l1, l2, lo)                  # (2l1+1, 2l2+1, 2lo+1)
        alpha = np.sqrt(2 * lo + 1)                 # 'component' norm, path_norm='none'
        block = alpha * np.einsum('uvw,ijk->uivjwk', w * sqrt_k[io], cg)
        block = block.reshape(mul1 * (2 * l1 + 1),
                              mul2 * (2 * l2 + 1),
                              mulo * (2 * lo + 1))
        a0, a1 = s1[i1]
        b0, b1 = s2[i2]
        o0, o1 = so[io]
        w3[b0:b1, a0:a1, o0:o1] += block.transpose(1, 0, 2)

    # bias: trainable zeros on the scalar (l=0, p=+1) output slice [0:16].
    bias_tp = np.zeros((1, dtp), np.float64)
    bias_tp[0, 0:n_scalars + n_gates] += np.zeros(n_scalars + n_gates)

    # ---- pack weight + bias for the kernel ----------------------------------
    #   w2d: (d2*d1, 2*dg) with columns [vals(dg) | sigmoid_args(dg)], dg = 32
    #     vals         = [scalar outputs (8) | gated l=1 outputs (24)]
    #     sigmoid_args = [scalar outputs (8) | gate scalars, each repeated 3x]
    #   out = vals * sigmoid(sigmoid_args)  ==  [SiLU(scalars) | gated * sig(gate)]
    dim_ir = 2 * l_gated + 1
    w3_flat = w3.reshape(d2 * d1, dtp)              # row index = b*d1 + a
    w_s = w3_flat[:, :n_scalars]
    w_g = w3_flat[:, n_scalars:n_scalars + n_gates]
    w_v = w3_flat[:, n_scalars + n_gates:]
    w2d = np.concatenate([w_s, w_v, w_s, np.repeat(w_g, dim_ir, axis=1)], axis=1)

    b_s = bias_tp[0, :n_scalars]
    b_g = bias_tp[0, n_scalars:n_scalars + n_gates]
    b_v = bias_tp[0, n_scalars + n_gates:]
    bias_packed = np.concatenate([b_s, b_v, b_s, np.repeat(b_g, dim_ir)])[None, :]

    return dict(
        w2d=jnp.asarray(w2d, jnp.float32),                  # (128, 64)
        bias_packed=jnp.asarray(bias_packed, jnp.float32),  # (1, 64)
        w3=jnp.asarray(w3, jnp.float32),                    # (4, 32, 40)  (reference)
        bias_tp=jnp.asarray(bias_tp, jnp.float32),          # (1, 40)      (reference)
        d1=d1, d2=d2,
        n_scalars=n_scalars, n_gates=n_gates, l_gated=l_gated,
    )


# ----------------------------------------------------------------------------
# Pallas kernel: fused bilinear tensor product + bias + swish gate
# ----------------------------------------------------------------------------

def _fctp_swishgate_kernel(x_ref, y_ref, w_ref, b_ref, o_ref):
    # x: (bn, D1)  y: (bn, D2)  w: (D2*D1, 2*DG)  b: (1, 2*DG)  o: (bn, DG)
    x = x_ref[...]
    y = y_ref[...]
    d2 = y_ref.shape[1]
    # z[n, b*D1 + a] = y[n, b] * x[n, a]  -> (bn, D2*D1) = (bn, 128)
    z = jnp.concatenate([x * y[:, b:b + 1] for b in range(d2)], axis=-1)
    # Single K=128 MXU matmul, f32 accumulation; bias broadcast-added.
    tp = jnp.dot(z, w_ref[...], preferred_element_type=jnp.float32) + b_ref[...]
    dg = o_ref.shape[1]
    vals = tp[:, :dg]         # [scalars | gated vectors]   (pre-activation values)
    gate_args = tp[:, dg:]    # [scalars | gates repeated]  (sigmoid arguments)
    o_ref[...] = vals * (1.0 / (1.0 + jnp.exp(-gate_args)))


def _round_up(n, m):
    return ((n + m - 1) // m) * m


def fctp_swishgate_forward(x, y, w2d, bias_packed, *, block_n=1024):
    """out[n] = Gate(TP(x[n], y[n]) + bias), out dim = w2d.shape[1] // 2."""
    n, d1 = x.shape
    d2 = y.shape[1]
    k, dpack = w2d.shape
    assert k == d1 * d2
    dg = dpack // 2

    # Choose a row tile: large (overhead-amortizing) but capped at N; pad tail.
    bn = _round_up(min(block_n, _round_up(n, 8)), 8)
    n_pad = _round_up(n, bn)
    if n_pad != n:
        x = jnp.pad(x, ((0, n_pad - n), (0, 0)))
        y = jnp.pad(y, ((0, n_pad - n), (0, 0)))

    out = pl.pallas_call(
        _fctp_swishgate_kernel,
        out_shape=jax.ShapeDtypeStruct((n_pad, dg), jnp.float32),
        grid=(n_pad // bn,),
        in_specs=[
            pl.BlockSpec((bn, d1), lambda i: (i, 0)),
            pl.BlockSpec((bn, d2), lambda i: (i, 0)),
            pl.BlockSpec((k, dpack), lambda i: (0, 0)),   # weight: VMEM resident
            pl.BlockSpec((1, dpack), lambda i: (0, 0)),   # packed bias
        ],
        out_specs=pl.BlockSpec((bn, dg), lambda i: (i, 0)),
        compiler_params=pltpu.CompilerParams(
            dimension_semantics=("parallel",)),
    )(x, y, w2d, bias_packed)
    return out[:n] if n_pad != n else out


# ----------------------------------------------------------------------------
# Pure-JAX reference (mirrors the module forward) + demo / correctness check
# ----------------------------------------------------------------------------

def reference_forward(x, y, w3, bias_tp, n_scalars, n_gates, l_gated):
    sig = lambda t: 1.0 / (1.0 + jnp.exp(-t))
    tp = jnp.einsum('na,nb,bao->no', x, y, w3) + bias_tp
    s = tp[:, :n_scalars]
    g = tp[:, n_scalars:n_scalars + n_gates]
    v = tp[:, n_scalars + n_gates:]
    gated = (v.reshape(v.shape[0], n_gates, 2 * l_gated + 1) * sig(g)[:, :, None])
    gated = gated.reshape(v.shape[0], -1)
    return jnp.concatenate([s * sig(s), gated], axis=-1)


if __name__ == "__main__":
    p = build_fctp_swishgate_params(seed=0)

    key = jax.random.PRNGKey(0)
    kx, ky = jax.random.split(key)
    n = 100                                   # small, not a multiple of the tile
    x = jax.random.normal(kx, (n, p["d1"]), dtype=jnp.float32)  # node feats (8x0e+8x1e)
    y = jax.random.normal(ky, (n, p["d2"]), dtype=jnp.float32)  # e.g. sph. harm. (1x0e+1x1e)

    # Default large-tile path (single grid step here) ...
    out = fctp_swishgate_forward(x, y, p["w2d"], p["bias_packed"])
    # ... and a small-tile path exercising multi-step grid + tail padding.
    out_tiled = fctp_swishgate_forward(x, y, p["w2d"], p["bias_packed"], block_n=32)
    out = jax.block_until_ready(out)
    out_tiled = jax.block_until_ready(out_tiled)

    ref = reference_forward(x, y, p["w3"], p["bias_tp"],
                            p["n_scalars"], p["n_gates"], p["l_gated"])
    ref = np.asarray(jax.block_until_ready(ref))

    np.testing.assert_allclose(np.asarray(out), ref, rtol=1e-5, atol=2e-5)
    np.testing.assert_allclose(np.asarray(out_tiled), ref, rtol=1e-5, atol=2e-5)

    print("KERNEL_OK")
</pallas_src>

<mosaic_0001>
module attributes {stable_mosaic.version = 11 : i64} {
  func.func @_fctp_swishgate_kernel(%arg0: i32, %arg1: memref<104x32xf32, #tpu.memory_space<vmem>>, %arg2: memref<104x4xf32, #tpu.memory_space<vmem>>, %arg3: memref<128x64xf32, #tpu.memory_space<vmem>>, %arg4: memref<1x64xf32, #tpu.memory_space<vmem>>, %arg5: memref<104x32xf32, #tpu.memory_space<vmem>>) attributes {dimension_semantics = [#tpu.dimension_semantics<parallel>], iteration_bounds = array<i64: 1>, scalar_prefetch = 0 : i64, scratch_operands = 0 : i64, tpu.core_type = #tpu.core_type<tc>, window_params = [{transform_indices = @transform_0, window_bounds = array<i64: 104, 32>}, {transform_indices = @transform_1, window_bounds = array<i64: 104, 4>}, {pipeline_mode = #tpu.pipeline_mode<synchronous>, transform_indices = @transform_2, window_bounds = array<i64: 128, 64>}, {pipeline_mode = #tpu.pipeline_mode<synchronous>, transform_indices = @transform_3, window_bounds = array<i64: 1, 64>}, {transform_indices = @transform_4, window_bounds = array<i64: 104, 32>}]} {
    %c0 = arith.constant 0 : index
    %c0_0 = arith.constant 0 : index
    %0 = vector.load %arg1[%c0, %c0_0] : memref<104x32xf32, #tpu.memory_space<vmem>>, vector<104x32xf32>
    %c0_1 = arith.constant 0 : index
    %c0_2 = arith.constant 0 : index
    %1 = vector.load %arg2[%c0_1, %c0_2] : memref<104x4xf32, #tpu.memory_space<vmem>>, vector<104x4xf32>
    %2 = vector.extract_strided_slice %1 {offsets = [0, 0], sizes = [104, 1], strides = [1, 1]} : vector<104x4xf32> to vector<104x1xf32>
    %3 = vector.broadcast %2 : vector<104x1xf32> to vector<104x32xf32>
    %4 = arith.mulf %0, %3 : vector<104x32xf32>
    %5 = vector.extract_strided_slice %1 {offsets = [0, 1], sizes = [104, 1], strides = [1, 1]} : vector<104x4xf32> to vector<104x1xf32>
    %6 = vector.broadcast %5 : vector<104x1xf32> to vector<104x32xf32>
    %7 = arith.mulf %0, %6 : vector<104x32xf32>
    %8 = vector.extract_strided_slice %1 {offsets = [0, 2], sizes = [104, 1], strides = [1, 1]} : vector<104x4xf32> to vector<104x1xf32>
    %9 = vector.broadcast %8 : vector<104x1xf32> to vector<104x32xf32>
    %10 = arith.mulf %0, %9 : vector<104x32xf32>
    %11 = vector.extract_strided_slice %1 {offsets = [0, 3], sizes = [104, 1], strides = [1, 1]} : vector<104x4xf32> to vector<104x1xf32>
    %12 = vector.broadcast %11 : vector<104x1xf32> to vector<104x32xf32>
    %13 = arith.mulf %0, %12 : vector<104x32xf32>
    %14 = tpu.concatenate %4, %7, %10, %13 in 1 : vector<104x32xf32>, vector<104x32xf32>, vector<104x32xf32>, vector<104x32xf32> -> vector<104x128xf32>
    %c0_3 = arith.constant 0 : index
    %c0_4 = arith.constant 0 : index
    %15 = vector.load %arg3[%c0_3, %c0_4] : memref<128x64xf32, #tpu.memory_space<vmem>>, vector<128x64xf32>
    %cst = arith.constant dense<0.000000e+00> : vector<104x64xf32>
    %16 = tpu.matmul %14, %15, %cst {dimension_numbers = #tpu.dot_dimension_numbers<[1], [0], [0], [1], [0, 0, 1, 1], [], []>} : vector<104x128xf32>, vector<128x64xf32>, vector<104x64xf32> -> vector<104x64xf32>
    %c0_5 = arith.constant 0 : index
    %c0_6 = arith.constant 0 : index
    %17 = vector.load %arg4[%c0_5, %c0_6] : memref<1x64xf32, #tpu.memory_space<vmem>>, vector<1x64xf32>
    %18 = vector.broadcast %17 : vector<1x64xf32> to vector<104x64xf32>
    %19 = arith.addf %16, %18 : vector<104x64xf32>
    %20 = vector.extract_strided_slice %19 {offsets = [0, 0], sizes = [104, 32], strides = [1, 1]} : vector<104x64xf32> to vector<104x32xf32>
    %21 = vector.extract_strided_slice %19 {offsets = [0, 32], sizes = [104, 32], strides = [1, 1]} : vector<104x64xf32> to vector<104x32xf32>
    %cst_7 = arith.constant 0.000000e+00 : f32
    %22 = vector.broadcast %cst_7 : f32 to vector<104x32xf32>
    %23 = arith.subf %22, %21 : vector<104x32xf32>
    %24 = math.exp %23 : vector<104x32xf32>
    %cst_8 = arith.constant 1.000000e+00 : f32
    %25 = vector.broadcast %cst_8 : f32 to vector<104x32xf32>
    %26 = arith.addf %25, %24 : vector<104x32xf32>
    %cst_9 = arith.constant 1.000000e+00 : f32
    %27 = vector.broadcast %cst_9 : f32 to vector<104x32xf32>
    %28 = arith.divf %27, %26 : vector<104x32xf32>
    %29 = arith.mulf %20, %28 : vector<104x32xf32>
    %c0_10 = arith.constant 0 : index
    %c0_11 = arith.constant 0 : index
    %30 = vector.load %arg5[%c0_10, %c0_11] : memref<104x32xf32, #tpu.memory_space<vmem>>, vector<104x32xf32>
    tpu.vector_store %arg5[%c0_10, %c0_11], %29 {strides = array<i32>} : memref<104x32xf32, #tpu.memory_space<vmem>>, vector<104x32xf32>,
    return
  }
  func.func @transform_0(%arg0: i32) -> (i32, i32) {
    %c0_i32 = arith.constant 0 : i32
    %c0_i32_0 = arith.constant 0 : i32
    return %arg0, %c0_i32 : i32, i32
  }
  func.func @transform_1(%arg0: i32) -> (i32, i32) {
    %c0_i32 = arith.constant 0 : i32
    %c0_i32_0 = arith.constant 0 : i32
    return %arg0, %c0_i32 : i32, i32
  }
  func.func @transform_2(%arg0: i32) -> (i32, i32) {
    %c0_i32 = arith.constant 0 : i32
    %c0_i32_0 = arith.constant 0 : i32
    %c0_i32_1 = arith.constant 0 : i32
    return %c0_i32, %c0_i32_0 : i32, i32
  }
  func.func @transform_3(%arg0: i32) -> (i32, i32) {
    %c0_i32 = arith.constant 0 : i32
    %c0_i32_0 = arith.constant 0 : i32
    %c0_i32_1 = arith.constant 0 : i32
    return %c0_i32, %c0_i32_0 : i32, i32
  }
  func.func @transform_4(%arg0: i32) -> (i32, i32) {
    %c0_i32 = arith.constant 0 : i32
    %c0_i32_0 = arith.constant 0 : i32
    return %arg0, %c0_i32 : i32, i32
  }
}

</mosaic_0001>

<bundles_post_ra>
// kernel: tpu_custom_call.1
= control target key start
LH: loop header
LB: loop body
LE: loop exit
PB: predicated region body
PF: predicated region fallthrough
CT: control target
= control target key end

     0   :  { %v1145_v0 = vmov 3   ;;  %v1146_v1 = vmov 2   ;;  %v1147_v4 = vmov 1   ;;  %v1148_v16 = vmov 0   ;;  %s1150_s8 = smov 64   ;;  %s1151_s13 = smov 32   ;;  %s1725_s1 = inlined_call_operand.vmem [shape: f32[104,4], index: 1, kind: input, shape index: {}]   ;;  %s1726_s2 = inlined_call_operand.vmem [shape: f32[128,64], index: 2, kind: input, shape index: {}]   ;;  %s1727_s0 = inlined_call_operand.vmem [shape: f32[104,32], index: 0, kind: input, shape index: {}]   ;;  %s1728_s3 = inlined_call_operand.vmem [shape: f32[1,64], index: 3, kind: input, shape index: {}]   ;;  %s1729_s4 = inlined_call_operand.vmem [shape: f32[104,32], index: 4, kind: output, shape index: {}]  }
   0x1   :  { %979 = vset.pattern.permute.xlu1 %v1145_v0  ;;  %978 = vset.pattern.permute.xlu0 %v1146_v1  ;;  %v1185_v2 = vld [vmem:[%s1725_s1] sm:$0xff]  ;;  %v31_v3 = vld [vmem:[%s1725_s1 + $0x8] sm:$0xff]  ;;  %v1196_v5 = vld [vmem:[%s1725_s1 + $0x38] sm:$0xff]  ;;  %v1149_v20 = vmov 0.0|0.0   ;;  %vm1152_vm0 = vmmov 0   ;;  %vm472_vm1 = vcmask 261120  }
   0x2   :  { %252 = vperm.xlu1 %979, %v1185_v2   ;;  %187 = vperm.xlu0 %978, %v1185_v2   ;;  %v38_v6 = vld [vmem:[%s1725_s1 + $0x40] sm:$0xff]  ;;  %v1209_v7 = vld [vmem:[%s1725_s1 + $0x48] sm:$0xff]  ;;  %v40_v8 = vld [vmem:[%s1725_s1 + $0x50] sm:$0xff]  ;;  %vm486_vm2 = vcmask 523264   ;;  %vm500_vm3 = vcmask 785408  }
   0x3   :  { %v1220_v9 = vld [vmem:[%s1725_s1 + $0x10] sm:$0xff]  ;;  %v1225_v10 = vld [vmem:[%s1725_s1 + $0x58] sm:$0xff]  ;;  %v1233_v11 = vld [vmem:[%s1725_s1 + $0x60] sm:$0xff]  ;;  %928 = vmatprep.subr.bf16.mxu0 %v1149_v20  ;;  %952 = vmatprep.subr.bf16.mxu1 %v1149_v20 }
   0x4   :  { %v33_v12 = vld [vmem:[%s1725_s1 + $0x18] sm:$0xff]  ;;  %v1248_v13 = vld [vmem:[%s1725_s1 + $0x20] sm:$0xff]  ;;  %v1255_v14 = vld [vmem:[%s1725_s1 + $0x28] sm:$0xff] }
   0x5   :  { %v1261_v15 = vld [vmem:[%s1725_s1 + $0x30] sm:$0xff]  ;;  %v514_v17 = vld [vmem:[%s1726_s2] sm:$0xff]  ;;  %v515_v18 = vld [vmem:[%s1726_s2 + $0x8] sm:$0xff] }
   0x6   :  { %980 = vset.pattern.permute.xlu1 %v1147_v4  ;;  %191 = vperm.xlu0 %978, %v31_v3   ;;  %v929_v19 = vpack.c.bf16 %v515_v18, %v514_v17  ;;  %v516_v21 = vld [vmem:[%s1726_s2 + $0x10] sm:$0xff]  ;;  %v517_v22 = vld [vmem:[%s1726_s2 + $0x18] sm:$0xff]  ;;  %v1310_v26 = vld [vmem:[%s1727_s0] sm:$0xff] }
   0x7   :  { %126 = vperm.xlu1 %980, %v31_v3   ;;  %v932_v25 = vpack.c.bf16 %v517_v22, %v516_v21  ;;  %v518_v28 = vld [vmem:[%s1726_s2 + $0x20] sm:$0xff]  ;;  %v519_v29 = vld [vmem:[%s1726_s2 + $0x28] sm:$0xff]  ;;  %v520_v36 = vld [vmem:[%s1726_s2 + $0x30] sm:$0xff] }
   0x8   :  { %930 = vmatpush3.bf16.msra.mxu0 %v929_v19  ;;  %960 = vmatpush3.bf16.msra.mxu1 %v929_v19  ;;  %v1325_v30 = vld [vmem:[%s1727_s0 + $0x8] sm:$0xff]  ;;  %v935_v32 = vpack.c.bf16 %v519_v29, %v518_v28  ;;  %v521_v37 = vld [vmem:[%s1726_s2 + $0x38] sm:$0xff]  ;;  %v522_v43 = vld [vmem:[%s1726_s2 + $0x40] sm:$0xff] }
   0x9   :  { %931 = vmatprep.subr.bf16.mxu0 %v1149_v20  ;;  %953 = vmatprep.subr.bf16.mxu1 %v1149_v20  ;;  %v938_v38 = vpack.c.bf16 %v521_v37, %v520_v36  ;;  %v523_v44 = vld [vmem:[%s1726_s2 + $0x48] sm:$0xff]  ;;  %v524_v49 = vld [vmem:[%s1726_s2 + $0x50] sm:$0xff]  ;;  %v525_v50 = vld [vmem:[%s1726_s2 + $0x58] sm:$0xff] }
   0xa   :  { %981 = vset.pattern.permute.xlu0 %v1147_v4  ;;  %v941_v46 = vpack.c.bf16 %v523_v44, %v522_v43  ;;  %v944_v51 = vpack.c.bf16 %v525_v50, %v524_v49  ;;  %v526_v52 = vld [vmem:[%s1726_s2 + $0x60] sm:$0xff]  ;;  %v527_v53 = vld [vmem:[%s1726_s2 + $0x68] sm:$0xff]  ;;  %v1374_v58 = vld [vmem:[%s1727_s0 + $0x38] sm:$0xff] }
   0xb   :  { %150 = vperm.xlu1 %980, %v1196_v5   ;;  %122 = vperm.xlu0 %981, %v1185_v2   ;;  %v947_v55 = vpack.c.bf16 %v527_v53, %v526_v52  ;;  %v1379_v59 = vld [vmem:[%s1727_s0 + $0x10] sm:$0xff]  ;;  %v529_v61 = vld [vmem:[%s1726_s2 + $0x78] sm:$0xff]  ;;  %v1435_v43 = vld [vmem:[%s1727_s0 + $0x48] sm:$0xff] }
   0xc   :  { %933 = vmatpush3.bf16.msra.mxu0 %v932_v25  ;;  %961 = vmatpush3.bf16.msra.mxu1 %v932_v25  ;;  %v528_v60 = vld [vmem:[%s1726_s2 + $0x70] sm:$0xff]  ;;  %s1154_s2 = smov 96   ;;  %v1440_v44 = vld [vmem:[%s1727_s0 + $0x20] sm:$0xff] }
   0xd   :  { %934 = vmatprep.subr.bf16.mxu0 %v1149_v20  ;;  %954 = vmatprep.subr.bf16.mxu1 %v1149_v20  ;;  %v950_v63 = vpack.c.bf16 %v529_v61, %v528_v60  ;;  %v1457_v60 = vld [vmem:[%s1727_s0 + $0x50] sm:$0xff]  ;;  %v1463_v61 = vld [vmem:[%s1727_s0 + $0x28] sm:$0xff] }
   0xf   :  { %982 = vset.pattern.permute.xlu1 %v1146_v1  ;;  %154 = vperm.xlu0 %981, %v38_v6  }
  0x10   :  { %215 = vperm.xlu1 %982, %v1196_v5   ;;  %936 = vmatpush3.bf16.msra.mxu0 %v935_v32 }
  0x11   :  { %962 = vmatpush3.bf16.msra.mxu1 %v935_v32  ;;  %937 = vmatprep.subr.bf16.mxu0 %v1149_v20 }
  0x12   :  { %955 = vmatprep.subr.bf16.mxu1 %v1149_v20 }
  0x13   :  { %158 = vperm.xlu0 %981, %v1209_v7  }
  0x14   :  { %983 = vset.pattern.permute.xlu1 %v1145_v0  ;;  %939 = vmatpush3.bf16.msra.mxu0 %v938_v38 }
  0x15   :  { %280 = vperm.xlu1 %983, %v1196_v5   ;;  %963 = vmatpush3.bf16.msra.mxu1 %v938_v38 }
  0x16   :  { %940 = vmatprep.subr.bf16.mxu0 %v1149_v20  ;;  %956 = vmatprep.subr.bf16.mxu1 %v1149_v20 }
  0x17   :  { %162 = vperm.xlu0 %981, %v40_v8  }
  0x18   :  { %942 = vmatpush3.bf16.msra.mxu0 %v941_v46 }
  0x19   :  { %984 = vset.pattern.permute.xlu1 %v1147_v4  ;;  %943 = vmatprep.subr.bf16.mxu0 %v1149_v20 }
  0x1a   :  { %130 = vperm.xlu1 %984, %v1220_v9   ;;  %964 = vmatpush3.bf16.msra.mxu1 %v941_v46 }
  0x1b   :  { %166 = vperm.xlu0 %981, %v1225_v10   ;;  %957 = vmatprep.subr.bf16.mxu1 %v1149_v20 }
  0x1c   :  { %945 = vmatpush3.bf16.msra.mxu0 %v944_v51 }
  0x1d   :  { %946 = vmatprep.subr.bf16.mxu0 %v1149_v20 }
  0x1e   :  { %985 = vset.pattern.permute.xlu1 %v1146_v1  ;;  %965 = vmatpush3.bf16.msra.mxu1 %v944_v51 }
  0x1f   :  { %195 = vperm.xlu1 %985, %v1220_v9   ;;  %170 = vperm.xlu0 %981, %v1233_v11  }
  0x20   :  { %958 = vmatprep.subr.bf16.mxu1 %v1149_v20  ;;  %948 = vmatpush3.bf16.msra.mxu0 %v947_v55 }
  0x21   :  { %949 = vmatprep.subr.bf16.mxu0 %v1149_v20 }
  0x22   :  { %966 = vmatpush3.bf16.msra.mxu1 %v947_v55 }
  0x23   :  { %219 = vperm.xlu1 %985, %v38_v6   ;;  %997 = vset.pattern.permute.xlu0 %v1145_v0 }
  0x24   :  { %256 = vperm.xlu0 %997, %v31_v3   ;;  %959 = vmatprep.subr.bf16.mxu1 %v1149_v20 }
  0x25   :  { %951 = vmatpush3.bf16.msra.mxu0 %v950_v63 }
  0x26   :  { %967 = vmatpush3.bf16.msra.mxu1 %v950_v63 }
  0x27   :  { %986 = vset.pattern.permute.xlu1 %v1145_v0 }
  0x28   :  { %284 = vperm.xlu1 %986, %v38_v6   ;;  %260 = vperm.xlu0 %997, %v1220_v9  }
  0x2c   :  { %987 = vset.pattern.permute.xlu1 %v1147_v4  ;;  %264 = vperm.xlu0 %997, %v33_v12  }
  0x2d   :  { %134 = vperm.xlu1 %987, %v33_v12  }
  0x30   :  { %268 = vperm.xlu0 %997, %v1248_v13  }
  0x31   :  { %988 = vset.pattern.permute.xlu1 %v1146_v1 }
  0x32   :  { %199 = vperm.xlu1 %988, %v33_v12  }
  0x34   :  { %272 = vperm.xlu0 %997, %v1255_v14  }
  0x36   :  { %223 = vperm.xlu1 %988, %v1209_v7  }
  0x38   :  { %276 = vperm.xlu0 %997, %v1261_v15  }
  0x3a   :  { %989 = vset.pattern.permute.xlu1 %v1145_v0 }
  0x3b   :  { %288 = vperm.xlu1 %989, %v1209_v7  }
  0x3c   :  { %1001 = vset.pattern.permute.xlu0 %v1148_v16 }
  0x3d   :  { %50 = vperm.xlu0 %1001, %v31_v3  }
  0x3f   :  { %990 = vset.pattern.permute.xlu1 %v1147_v4 }
  0x40   :  { %138 = vperm.xlu1 %990, %v1248_v13  }
  0x41   :  { %85 = vperm.xlu0 %1001, %v38_v6  }
  0x44   :  { %991 = vset.pattern.permute.xlu1 %v1146_v1 }
  0x45   :  { %203 = vperm.xlu1 %991, %v1248_v13   ;;  %60 = vperm.xlu0 %1001, %v33_v12  }
  0x49   :  { %227 = vperm.xlu1 %991, %v40_v8   ;;  %95 = vperm.xlu0 %1001, %v40_v8  }
  0x4d   :  { %992 = vset.pattern.permute.xlu1 %v1145_v0 }
  0x4e   :  { %292 = vperm.xlu1 %992, %v40_v8  }
  0x52   :  { %993 = vset.pattern.permute.xlu1 %v1147_v4 }
  0x53   :  { %142 = vperm.xlu1 %993, %v1255_v14  }
  0x57   :  { %994 = vset.pattern.permute.xlu1 %v1146_v1 }
  0x58   :  { %207 = vperm.xlu1 %994, %v1255_v14  }
  0x5c   :  { %231 = vperm.xlu1 %994, %v1225_v10  }
  0x60   :  { %995 = vset.pattern.permute.xlu1 %v1145_v0 }
  0x61   :  { %296 = vperm.xlu1 %995, %v1225_v10  }
  0x65   :  { %996 = vset.pattern.permute.xlu1 %v1147_v4 }
  0x66   :  { %146 = vperm.xlu1 %996, %v1261_v15  }
  0x6a   :  { %998 = vset.pattern.permute.xlu1 %v1146_v1 }
  0x6b   :  { %211 = vperm.xlu1 %998, %v1261_v15  }
  0x6f   :  { %235 = vperm.xlu1 %998, %v1233_v11  }
  0x73   :  { %999 = vset.pattern.permute.xlu1 %v1145_v0 }
  0x74   :  { %300 = vperm.xlu1 %999, %v1233_v11  }
  0x78   :  { %1000 = vset.pattern.permute.xlu1 %v1148_v16 }
  0x79   :  { %45 = vperm.xlu1 %1000, %v1185_v2  }
  0x7d   :  { %80 = vperm.xlu1 %1000, %v1196_v5   ;;  %v1153_v5 = vmov 0.0  }
  0x7e   :  { %889 = vmatprep.mubr.msk.f32.mxu0 %vm1152_vm0, %v1153_v5  ;;  %910 = vmatprep.mubr.msk.f32.mxu1 %vm1152_vm0, %v1153_v5 }
  0x81   :  { %55 = vperm.xlu1 %1000, %v1220_v9   ;;  %v1305_v23 = vpop.permute.xlu1 %252  ;;  %v188_v24 = vpop.permute.xlu0 %187 }
  0x82   :  { %v238_v27 = vmul.f32 %v188_v24, %v1310_v26  ;;  %v303_v12 = vmul.f32 %v1305_v23, %v1310_v26  ;;  %v1411_v23 = vld [vmem:[%s1727_s0 + $0x40] sm:$0xff] }
  0x85   :  { %90 = vperm.xlu1 %1000, %v1209_v7   ;;  %v192_v31 = vpop.permute.xlu0 %191 }
  0x86   :  { %v127_v33 = vpop.permute.xlu1 %126  ;;  %v239_v34 = vmul.f32 %v192_v31, %v1325_v30 }
  0x87   :  { %v174_v41 = vmul.f32 %v127_v33, %v1325_v30 }
  0x88   :  { %v1007_v35 = vpack.i.bf16 %v239_v34, %v238_v27  ;;  %v1416_v27 = vld [vmem:[%s1727_s0 + $0x18] sm:$0xff] }
  0x89   :  { %65 = vperm.xlu1 %1000, %v1248_v13  }
  0x8a   :  { %v151_v39 = vpop.permute.xlu1 %150  ;;  %v123_v40 = vpop.permute.xlu0 %122  ;;  %1008 = vrot.lane.b32.xlu0 %v1007_v35, %s1150_s8 }
  0x8b   :  { %v173_v42 = vmul.f32 %v123_v40, %v1310_v26  ;;  %v180_v1 = vmul.f32 %v151_v39, %v1374_v58 }
  0x8d   :  { %v1002_v45 = vpack.i.bf16 %v174_v41, %v173_v42 }
  0x8e   :  { %v1348_v47 = vpop.permute.xlu0 %154 }
  0x8f   :  { %v216_v48 = vpop.permute.xlu1 %215  ;;  %1003 = vrot.lane.b32.xlu1 %v1002_v45, %s1151_s13  ;;  %v181_v31 = vmul.f32 %v1348_v47, %v1411_v23 }
  0x90   :  { %v245_v20 = vmul.f32 %v216_v48, %v1374_v58 }
  0x92   :  { %v1365_v54 = vpop.permute.xlu0 %158 }
  0x93   :  { %v182_v46 = vmul.f32 %v1365_v54, %v1435_v43 }
  0x94   :  { %v281_v56 = vpop.permute.xlu1 %280 }
  0x95   :  { %v310_v21 = vmul.f32 %v281_v56, %v1374_v58 }
  0x96   :  { %v1369_v57 = vpop.permute.xlu0 %162 }
  0x97   :  { %v183_v63 = vmul.f32 %v1369_v57, %v1457_v60 }
  0x99   :  { %v131_v62 = vpop.permute.xlu1 %130 }
  0x9a   :  { %v175_v2 = vmul.f32 %v131_v62, %v1379_v59  ;;  %v1391_v3 = vpop.permute.xlu0 %166 }
  0x9c   :  { %v1017_v4 = vpack.i.bf16 %v175_v2, %v180_v1 }
  0x9e   :  { %v196_v6 = vpop.permute.xlu1 %195  ;;  %1018 = vrot.lane.b32.xlu0 %v1017_v4, %s1151_s13  ;;  %v1398_v7 = vpop.permute.xlu0 %170 }
  0x9f   :  { %v240_v16 = vmul.f32 %v196_v6, %v1379_v59 }
  0xa1   :  { %v1022_v24 = vpack.i.bf16 %v240_v16, %v245_v20  ;;  %v1478_v16 = vld [vmem:[%s1727_s0 + $0x58] sm:$0xff] }
  0xa2   :  { %v220_v8 = vpop.permute.xlu1 %219 }
  0xa3   :  { %v257_v9 = vpop.permute.xlu0 %256  ;;  %v246_v37 = vmul.f32 %v220_v8, %v1411_v23 }
  0xa4   :  { %v304_v13 = vmul.f32 %v257_v9, %v1325_v30 }
  0xa6   :  { %v1012_v17 = vpack.i.bf16 %v304_v13, %v303_v12 }
  0xa7   :  { %v285_v18 = vpop.permute.xlu1 %284  ;;  %v261_v19 = vpop.permute.xlu0 %260 }
  0xa8   :  { %v305_v22 = vmul.f32 %v261_v19, %v1379_v59  ;;  %1013 = vrot.lane.b32.xlu1 %v1012_v17, %s1154_s2  ;;  %v311_v35 = vmul.f32 %v285_v18, %v1411_v23  ;;  %v1483_v17 = vld [vmem:[%s1727_s0 + $0x30] sm:$0xff]  ;;  %v184_v19 = vmul.f32 %v1391_v3, %v1478_v16 }
  0xaa   :  { %v1027_v25 = vpack.i.bf16 %v305_v22, %v310_v21 }
  0xab   :  { %v265_v28 = vpop.permute.xlu0 %264 }
  0xac   :  { %v135_v29 = vpop.permute.xlu1 %134  ;;  %1028 = vrot.lane.b32.xlu0 %v1027_v25, %s1154_s2  ;;  %1023 = vrot.lane.b32.xlu1 %v1022_v24, %s1150_s8  ;;  %v306_v33 = vmul.f32 %v265_v28, %v1416_v27 }
  0xad   :  { %v176_v32 = vmul.f32 %v135_v29, %v1416_v27 }
  0xae   :  { %v1042_v39 = vpack.i.bf16 %v306_v33, %v311_v35 }
  0xaf   :  { %v1032_v34 = vpack.i.bf16 %v176_v32, %v181_v31  ;;  %v1495_v31 = vld [vmem:[%s1727_s0 + $0x60] sm:$0xff] }
  0xb0   :  { %v185_v33 = vmul.f32 %v1398_v7, %v1495_v31 }
  0xb1   :  { %v200_v36 = vpop.permute.xlu1 %199  ;;  %1033 = vrot.lane.b32.xlu1 %v1032_v34, %s1151_s13 }
  0xb2   :  { %v241_v38 = vmul.f32 %v200_v36, %v1416_v27 }
  0xb4   :  { %v1037_v40 = vpack.i.bf16 %v241_v38, %v246_v37 }
  0xb5   :  { %v224_v41 = vpop.permute.xlu1 %223  ;;  %1043 = vrot.lane.b32.xlu1 %v1042_v39, %s1154_s2 }
  0xb6   :  { %1038 = vrot.lane.b32.xlu0 %v1037_v40, %s1150_s8  ;;  %v247_v51 = vmul.f32 %v224_v41, %v1435_v43 }
  0xb9   :  { %100 = vperm.xlu1 %1000, %v1225_v10   ;;  %v269_v10 = vpop.permute.xlu0 %268 }
  0xba   :  { %v289_v42 = vpop.permute.xlu1 %288  ;;  %70 = vperm.xlu0 %1001, %v1255_v14   ;;  %v307_v48 = vmul.f32 %v269_v10, %v1440_v44 }
  0xbb   :  { %v312_v14 = vmul.f32 %v289_v42, %v1435_v43 }
  0xbd   :  { %v1057_v53 = vpack.i.bf16 %v307_v48, %v312_v14  ;;  %v273_v2 = vpop.permute.xlu0 %272 }
  0xbe   :  { %v308_v4 = vmul.f32 %v273_v2, %v1463_v61 }
  0xbf   :  { %v139_v45 = vpop.permute.xlu1 %138 }
  0xc0   :  { %v177_v47 = vmul.f32 %v139_v45, %v1440_v44 }
  0xc1   :  { %v277_v34 = vpop.permute.xlu0 %276 }
  0xc2   :  { %v1047_v49 = vpack.i.bf16 %v177_v47, %v182_v46  ;;  %v309_v36 = vmul.f32 %v277_v34, %v1483_v17 }
  0xc4   :  { %v204_v50 = vpop.permute.xlu1 %203  ;;  %1048 = vrot.lane.b32.xlu0 %v1047_v49, %s1151_s13 }
  0xc5   :  { %v242_v52 = vmul.f32 %v204_v50, %v1440_v44  ;;  %v51_v40 = vpop.permute.xlu0 %50 }
  0xc7   :  { %v1052_v55 = vpack.i.bf16 %v242_v52, %v247_v51  ;;  %v109_v52 = vmul.f32 %v51_v40, %v1325_v30 }
  0xc8   :  { %v228_v56 = vpop.permute.xlu1 %227  ;;  %1058 = vrot.lane.b32.xlu0 %v1057_v53, %s1154_s2 }
  0xc9   :  { %1053 = vrot.lane.b32.xlu1 %v1052_v55, %s1150_s8  ;;  %v86_v45 = vpop.permute.xlu0 %85 }
  0xcc   :  { %105 = vperm.xlu0 %1001, %v1233_v11  }
  0xcd   :  { %v293_v54 = vpop.permute.xlu1 %292  ;;  %75 = vperm.xlu1 %1000, %v1261_v15   ;;  %v61_v7 = vpop.permute.xlu0 %60 }
  0xce   :  { %v313_v15 = vmul.f32 %v293_v54, %v1457_v60 }
  0xd0   :  { %1092 = vset.pattern.permute.xlu0 %v1145_v0  ;;  %v248_v0 = vmul.f32 %v228_v56, %v1457_v60  ;;  %v1072_v9 = vpack.i.bf16 %v308_v4, %v313_v15 }
  0xd1   :  { %v1511_v10 = vpop.permute.xlu0 %95 }
  0xd2   :  { %v143_v62 = vpop.permute.xlu1 %142 }
  0xd3   :  { %v178_v11 = vmul.f32 %v143_v62, %v1463_v61 }
  0xd5   :  { %v1062_v1 = vpack.i.bf16 %v178_v11, %v183_v63 }
  0xd7   :  { %v208_v6 = vpop.permute.xlu1 %207  ;;  %1063 = vrot.lane.b32.xlu1 %v1062_v1, %s1151_s13 }
  0xd8   :  { %v243_v8 = vmul.f32 %v208_v6, %v1463_v61 }
  0xda   :  { %v1067_v12 = vpack.i.bf16 %v243_v8, %v248_v0 }
  0xdb   :  { %v232_v13 = vpop.permute.xlu1 %231  ;;  %1073 = vrot.lane.b32.xlu1 %v1072_v9, %s1154_s2 }
  0xdc   :  { %1068 = vrot.lane.b32.xlu0 %v1067_v12, %s1150_s8  ;;  %v249_v24 = vmul.f32 %v232_v13, %v1478_v16 }
  0xe0   :  { %v297_v57 = vpop.permute.xlu1 %296 }
  0xe1   :  { %v314_v28 = vmul.f32 %v297_v57, %v1478_v16 }
  0xe5   :  { %v147_v18 = vpop.permute.xlu1 %146 }
  0xe6   :  { %v179_v20 = vmul.f32 %v147_v18, %v1483_v17 }
  0xe8   :  { %v1077_v21 = vpack.i.bf16 %v179_v20, %v184_v19 }
  0xea   :  { %v212_v22 = vpop.permute.xlu1 %211  ;;  %1078 = vrot.lane.b32.xlu0 %v1077_v21, %s1151_s13 }
  0xeb   :  { %v244_v25 = vmul.f32 %v212_v22, %v1483_v17 }
  0xed   :  { %v1082_v29 = vpack.i.bf16 %v244_v25, %v249_v24 }
  0xee   :  { %v236_v32 = vpop.permute.xlu1 %235  ;;  %455 = vrot.lane.b32.xlu0 %v314_v28, %s1154_s2  ;;  %v116_v28 = vmul.f32 %v86_v45, %v1411_v23 }
  0xef   :  { %v250_v3 = vmul.f32 %v236_v32, %v1495_v31  ;;  %1083 = vrot.lane.b32.xlu1 %v1082_v29, %s1150_s8  ;;  %v111_v29 = vmul.f32 %v61_v7, %v1416_v27 }
  0xf2   :  { %405 = vrot.lane.b32.xlu0 %v250_v3, %s1150_s8 }
  0xf3   :  { %v301_v35 = vpop.permute.xlu1 %300  ;;  %353 = vrot.lane.b32.xlu1 %v185_v33, %s1151_s13 }
  0xf4   :  { %v315_v37 = vmul.f32 %v301_v35, %v1495_v31 }
  0xf6   :  { %v1087_v38 = vpack.i.bf16 %v315_v37, %v309_v36 }
  0xf8   :  { %v46_v39 = vpop.permute.xlu1 %45  ;;  %1088 = vrot.lane.b32.xlu1 %v1087_v38, %s1154_s2 }
  0xf9   :  { %v108_v49 = vmul.f32 %v46_v39, %v1310_v26 }
  0xfc   :  { %v81_v41 = vpop.permute.xlu1 %80  ;;  %v1009_v14 = vpop.permute.xlu0 %1008 }
  0xfd   :  { %v1010_v51 = vunpack.i.l.bf16 %v1009_v14  ;;  %v115_v62 = vmul.f32 %v81_v41, %v1374_v58  ;;  %v1011_v15 = vunpack.i.h.bf16 %v1009_v14 }
 0x100   :  { %v56_v42 = vpop.permute.xlu1 %55 }
 0x101   :  { %v110_v11 = vmul.f32 %v56_v42, %v1379_v59 }
 0x104   :  { %v1507_v46 = vpop.permute.xlu1 %90 }
 0x105   :  { %v117_v14 = vmul.f32 %v1507_v46, %v1435_v43 }
 0x108   :  { %v1509_v47 = vpop.permute.xlu1 %65 }
 0x10c   :  { %v1004_v48 = vpop.permute.xlu1 %1003 }
 0x10d   :  { %v1005_v50 = vunpack.i.l.bf16 %v1004_v48  ;;  %v1006_v53 = vunpack.i.h.bf16 %v1004_v48 }
 0x10f   :  { %v473_v56 = vsel %vm472_vm1, %v108_v49, %v1005_v50  ;;  %v474_v6 = vsel %vm472_vm1, %v109_v52, %v1006_v53  ;;  %v112_v49 = vmul.f32 %v1509_v47, %v1440_v44 }
 0x110   :  { %v1019_v55 = vpop.permute.xlu0 %1018  ;;  %v487_v26 = vsel %vm486_vm2, %v473_v56, %v1010_v51  ;;  %v488_v58 = vsel %vm486_vm2, %v474_v6, %v1011_v15 }
 0x111   :  { %v1020_v1 = vunpack.i.l.bf16 %v1019_v55  ;;  %v1021_v2 = vunpack.i.h.bf16 %v1019_v55 }
 0x113   :  { %v480_v59 = vsel %vm472_vm1, %v115_v62, %v1020_v1  ;;  %v475_v20 = vsel %vm472_vm1, %v110_v11, %v1021_v2  ;;  %v118_v2 = vmul.f32 %v1511_v10, %v1457_v60 }
 0x11a   :  { %v1014_v54 = vpop.permute.xlu1 %1013 }
 0x11b   :  { %v1015_v63 = vunpack.i.l.bf16 %v1014_v54  ;;  %v1016_v4 = vunpack.i.h.bf16 %v1014_v54 }
 0x11d   :  { %v501_v30 = vsel %vm500_vm3, %v487_v26, %v1015_v63  ;;  %v502_v18 = vsel %vm500_vm3, %v488_v58, %v1016_v4 }
 0x11e   :  { %v1029_v0 = vpop.permute.xlu0 %1028  ;;  %v1024_v8 = vpop.permute.xlu1 %1023  ;;  %890 = vmatmul.mubr.f32.vlgmr.msra.gmra.mrb[0].mxu0 %v501_v30 }
 0x11f   :  { %v1030_v9 = vunpack.i.l.bf16 %v1029_v0  ;;  %v1026_v12 = vunpack.i.h.bf16 %v1024_v8  ;;  %v1025_v13 = vunpack.i.l.bf16 %v1024_v8  ;;  %892 = vmatprep.mubr.msk.f32.mxu0 %vm1152_vm0, %v1153_v5  ;;  %v1031_v57 = vunpack.i.h.bf16 %v1029_v0 }
 0x121   :  { %v494_v19 = vsel %vm486_vm2, %v480_v59, %v1025_v13  ;;  %v489_v22 = vsel %vm486_vm2, %v475_v20, %v1026_v12 }
 0x122   :  { %893 = vmatmul.mubr.f32.gmra.mrb[2].mxu0 %v502_v18  ;;  %v508_v21 = vsel %vm500_vm3, %v494_v19, %v1030_v9  ;;  %v503_v25 = vsel %vm500_vm3, %v489_v22, %v1031_v57 }
 0x123   :  { %v1034_v24 = vpop.permute.xlu1 %1033  ;;  %911 = vmatmul.mubr.f32.vlgmr.msra.gmra.mrb[0].mxu1 %v508_v21  ;;  %895 = vmatprep.mubr.msk.f32.mxu0 %vm1152_vm0, %v1153_v5 }
 0x124   :  { %913 = vmatprep.mubr.msk.f32.mxu1 %vm1152_vm0, %v1153_v5  ;;  %v1036_v32 = vunpack.i.h.bf16 %v1034_v24  ;;  %v1035_v3 = vunpack.i.l.bf16 %v1034_v24 }
 0x126   :  { %896 = vmatmul.mubr.f32.gmra.mrb[4].mxu0 %v503_v25  ;;  %v476_v39 = vsel %vm472_vm1, %v111_v29, %v1036_v32  ;;  %v481_v40 = vsel %vm472_vm1, %v116_v28, %v1035_v3 }
 0x127   :  { %v1044_v33 = vpop.permute.xlu1 %1043  ;;  %898 = vmatprep.mubr.msk.f32.mxu0 %vm1152_vm0, %v1153_v5 }
 0x128   :  { %v1039_v34 = vpop.permute.xlu0 %1038  ;;  %v1046_v37 = vunpack.i.h.bf16 %v1044_v33  ;;  %v1045_v38 = vunpack.i.l.bf16 %v1044_v33 }
 0x129   :  { %v1041_v35 = vunpack.i.h.bf16 %v1039_v34  ;;  %v1040_v36 = vunpack.i.l.bf16 %v1039_v34 }
 0x12b   :  { %v490_v23 = vsel %vm486_vm2, %v476_v39, %v1041_v35  ;;  %v495_v27 = vsel %vm486_vm2, %v481_v40, %v1040_v36 }
 0x12c   :  { %v504_v41 = vsel %vm500_vm3, %v490_v23, %v1046_v37  ;;  %v509_v42 = vsel %vm500_vm3, %v495_v27, %v1045_v38 }
 0x12d   :  { %899 = vmatmul.mubr.f32.gmra.mrb[6].mxu0 %v504_v41  ;;  %914 = vmatmul.mubr.f32.gmra.mrb[2].mxu1 %v509_v42 }
 0x12e   :  { %901 = vmatprep.mubr.msk.f32.mxu0 %vm1152_vm0, %v1153_v5  ;;  %916 = vmatprep.mubr.msk.f32.mxu1 %vm1152_vm0, %v1153_v5 }
 0x138   :  { %v101_v45 = vpop.permute.xlu1 %100 }
 0x139   :  { %v71_v7 = vpop.permute.xlu0 %70  ;;  %v119_v21 = vmul.f32 %v101_v45, %v1478_v16 }
 0x13a   :  { %v113_v4 = vmul.f32 %v71_v7, %v1463_v61 }
 0x13c   :  { %v1054_v50 = vpop.permute.xlu1 %1053 }
 0x13d   :  { %v1049_v48 = vpop.permute.xlu0 %1048  ;;  %v1056_v56 = vunpack.i.h.bf16 %v1054_v50  ;;  %v1055_v54 = vunpack.i.l.bf16 %v1054_v50 }
 0x13e   :  { %v1051_v51 = vunpack.i.h.bf16 %v1049_v48  ;;  %v1050_v52 = vunpack.i.l.bf16 %v1049_v48 }
 0x140   :  { %v477_v53 = vsel %vm472_vm1, %v112_v49, %v1051_v51  ;;  %v482_v55 = vsel %vm472_vm1, %v117_v14, %v1050_v52 }
 0x141   :  { %v1059_v62 = vpop.permute.xlu0 %1058  ;;  %v491_v15 = vsel %vm486_vm2, %v477_v53, %v1056_v56  ;;  %v496_v1 = vsel %vm486_vm2, %v482_v55, %v1055_v54 }
 0x142   :  { %v1061_v63 = vunpack.i.h.bf16 %v1059_v62  ;;  %v1060_v11 = vunpack.i.l.bf16 %v1059_v62 }
 0x144   :  { %v505_v43 = vsel %vm500_vm3, %v491_v15, %v1061_v63  ;;  %v510_v44 = vsel %vm500_vm3, %v496_v1, %v1060_v11 }
 0x145   :  { %902 = vmatmul.mubr.f32.gmra.mrb[8].mxu0 %v505_v43  ;;  %917 = vmatmul.mubr.f32.gmra.mrb[4].mxu1 %v510_v44 }
 0x146   :  { %904 = vmatprep.mubr.msk.f32.mxu0 %vm1152_vm0, %v1153_v5  ;;  %919 = vmatprep.mubr.msk.f32.mxu1 %vm1152_vm0, %v1153_v5 }
 0x14b   :  { %v106_v46 = vpop.permute.xlu0 %105 }
 0x14c   :  { %v76_v47 = vpop.permute.xlu1 %75  ;;  %v120_v33 = vmul.f32 %v106_v46, %v1495_v31 }
 0x14d   :  { %v114_v16 = vmul.f32 %v76_v47, %v1483_v17 }
 0x14f   :  { %v1069_v30 = vpop.permute.xlu0 %1068 }
 0x150   :  { %v1064_v26 = vpop.permute.xlu1 %1063  ;;  %v1071_v12 = vunpack.i.h.bf16 %v1069_v30  ;;  %v1070_v13 = vunpack.i.l.bf16 %v1069_v30 }
 0x151   :  { %v1066_v6 = vunpack.i.h.bf16 %v1064_v26  ;;  %v1065_v0 = vunpack.i.l.bf16 %v1064_v26 }
 0x153   :  { %v478_v8 = vsel %vm472_vm1, %v113_v4, %v1066_v6  ;;  %v483_v9 = vsel %vm472_vm1, %v118_v2, %v1065_v0 }
 0x154   :  { %v1074_v58 = vpop.permute.xlu1 %1073  ;;  %v492_v18 = vsel %vm486_vm2, %v478_v8, %v1071_v12  ;;  %v497_v19 = vsel %vm486_vm2, %v483_v9, %v1070_v13 }
 0x155   :  { %v1076_v59 = vunpack.i.h.bf16 %v1074_v58  ;;  %v1075_v57 = vunpack.i.l.bf16 %v1074_v58 }
 0x157   :  { %v506_v60 = vsel %vm500_vm3, %v492_v18, %v1076_v59  ;;  %v511_v61 = vsel %vm500_vm3, %v497_v19, %v1075_v57 }
 0x158   :  { %905 = vmatmul.mubr.f32.gmra.mrb[10].mxu0 %v506_v60  ;;  %920 = vmatmul.mubr.f32.gmra.mrb[6].mxu1 %v511_v61 }
 0x159   :  { %922 = vmatprep.mubr.msk.f32.mxu1 %vm1152_vm0, %v1153_v5  ;;  %907 = vmatprep.mubr.msk.f32.mxu0 %vm1152_vm0, %v1153_v5 }
 0x15c   :  { %v1079_v10 = vpop.permute.xlu0 %1078 }
 0x15d   :  { %v1080_v20 = vunpack.i.l.bf16 %v1079_v10  ;;  %v1081_v34 = vunpack.i.h.bf16 %v1079_v10 }
 0x15f   :  { %v484_v25 = vsel %vm472_vm1, %v119_v21, %v1080_v20  ;;  %v479_v23 = vsel %vm472_vm1, %v114_v16, %v1081_v34 }
 0x160   :  { %v456_v28 = vpop.permute.xlu0 %455 }
 0x161   :  { %v1084_v22 = vpop.permute.xlu1 %1083 }
 0x162   :  { %v1085_v24 = vunpack.i.l.bf16 %v1084_v22  ;;  %v1086_v35 = vunpack.i.h.bf16 %v1084_v22 }
 0x164   :  { %v498_v29 = vsel %vm486_vm2, %v484_v25, %v1085_v24  ;;  %v406_v38 = vpop.permute.xlu0 %405  ;;  %v493_v27 = vsel %vm486_vm2, %v479_v23, %v1086_v35 }
 0x165   :  { %v354_v32 = vpop.permute.xlu1 %353  ;;  %v512_v3 = vsel %vm500_vm3, %v498_v29, %v456_v28 }
 0x166   :  { %923 = vmatmul.mubr.f32.gmra.mrb[8].mxu1 %v512_v3  ;;  %v485_v36 = vsel %vm472_vm1, %v120_v33, %v354_v32 }
 0x167   :  { %925 = vmatprep.mubr.msk.f32.mxu1 %vm1152_vm0, %v1153_v5  ;;  %v499_v41 = vsel %vm486_vm2, %v485_v36, %v406_v38  ;;  %v1593_v5 = vld [vmem:[%s1728_s3] ss:$0 sm:$0xff] }
 0x16a   :  { %v1089_v37 = vpop.permute.xlu1 %1088 }
 0x16b   :  { %v1091_v39 = vunpack.i.h.bf16 %v1089_v37  ;;  %v1090_v40 = vunpack.i.l.bf16 %v1089_v37 }
 0x16d   :  { %v507_v31 = vsel %vm500_vm3, %v493_v27, %v1090_v40  ;;  %v513_v42 = vsel %vm500_vm3, %v499_v41, %v1091_v39 }
 0x16e   :  { %908 = vmatmul.mubr.f32.gmra.mrb[12].mxu0 %v507_v31  ;;  %926 = vmatmul.mubr.f32.gmra.mrb[10].mxu1 %v513_v42 }
 0x1f1   :  { %v603_v17 = vpop.f32.mrb[0].mxu0 }
 0x1f2   :  { %v1596_v45 = vadd.f32 %v1593_v5, %v603_v17  ;;  %v891_v7 = vpop.f32.mrb[1].mxu0 }
 0x1f4   :  { %v667_v48 = vsub.f32 0.0, %v1596_v45 }
 0x1f5   :  { %v608_v14 = vpop.f32.mrb[2].mxu0 }
 0x1f6   :  { %v680_v49 = vmul.f32 1.442695, %v667_v48  ;;  %v1600_v50 = vadd.f32 %v1593_v5, %v608_v14  ;;  %v894_v51 = vpop.f32.mrb[3].mxu0  ;;  %v638_v52 = vpop.f32.mrb[0].mxu1 }
 0x1f7   :  { %v1603_v53 = vadd.f32 %v1593_v5, %v638_v52  ;;  %v912_v55 = vpop.f32.mrb[1].mxu1 }
 0x1f8   :  { %1093 = vpow2.f32 %v680_v49  ;;  %v668_v56 = vsub.f32 0.0, %v1600_v50 }
 0x1f9   :  { %v674_v54 = vsub.f32 0.0, %v1603_v53  ;;  %v613_v62 = vpop.f32.mrb[4].mxu0 }
 0x1fa   :  { %v682_v63 = vmul.f32 1.442695, %v668_v56  ;;  %v897_v11 = vpop.f32.mrb[5].mxu0  ;;  %v1608_v1 = vadd.f32 %v1593_v5, %v613_v62 }
 0x1fb   :  { %v694_v15 = vmul.f32 1.442695, %v674_v54 }
 0x1fc   :  { %1095 = vpow2.f32 %v682_v63  ;;  %v669_v43 = vsub.f32 0.0, %v1608_v1 }
 0x1fd   :  { %1097 = vpow2.f32 %v694_v15 }
 0x1fe   :  { %v684_v6 = vmul.f32 1.442695, %v669_v43 }
 0x200   :  { %v618_v44 = vpop.f32.mrb[6].mxu0  ;;  %v643_v46 = vpop.f32.mrb[2].mxu1 }
 0x201   :  { %v1612_v47 = vadd.f32 %v1593_v5, %v643_v46  ;;  %v900_v26 = vpop.f32.mrb[7].mxu0  ;;  %v915_v2 = vpop.f32.mrb[3].mxu1  ;;  %v1617_v19 = vadd.f32 %v1593_v5, %v618_v44 }
 0x202   :  { %v1094_v4 = vpop.eup %1093 }
 0x203   :  { %v706_v30 = vadd.f32 1.0, %v1094_v4  ;;  %v675_v0 = vsub.f32 0.0, %v1612_v47  ;;  %v670_v20 = vsub.f32 0.0, %v1617_v19 }
 0x205   :  { %1099 = vrcp.f32 %v706_v30  ;;  %v696_v8 = vmul.f32 1.442695, %v675_v0  ;;  %v686_v32 = vmul.f32 1.442695, %v670_v20 }
 0x206   :  { %v1096_v9 = vpop.eup %1095  ;;  %1101 = vpow2.f32 %v684_v6 }
 0x207   :  { %v1098_v12 = vpop.eup %1097  ;;  %1103 = vpow2.f32 %v696_v8  ;;  %v707_v58 = vadd.f32 1.0, %v1096_v9 }
 0x208   :  { %v713_v13 = vadd.f32 1.0, %v1098_v12 }
 0x20a   :  { %1105 = vrcp.f32 %v713_v13 }
 0x20b   :  { %1107 = vrcp.f32 %v707_v58 }
 0x20f   :  { %v1100_v59 = vpop.eup %1099 }
 0x210   :  { %758 = vrot.lane.b32.xlu0 %v1100_v59, %s1154_s2  ;;  %v1102_v57 = vpop.eup %1101 }
 0x211   :  { %v1104_v18 = vpop.eup %1103  ;;  %v708_v10 = vadd.f32 1.0, %v1102_v57 }
 0x212   :  { %v714_v60 = vadd.f32 1.0, %v1104_v18 }
 0x214   :  { %v1106_v61 = vpop.eup %1105  ;;  %1109 = vrcp.f32 %v714_v60 }
 0x215   :  { %772 = vrot.lane.b32.xlu1 %v1106_v61, %s1154_s2  ;;  %v1108_v21 = vpop.eup %1107  ;;  %1111 = vrcp.f32 %v708_v10 }
 0x216   :  { %1113 = vpow2.f32 %v686_v32 }
 0x218   :  { %v623_v22 = vpop.f32.mrb[8].mxu0  ;;  %v648_v24 = vpop.f32.mrb[4].mxu1 }
 0x219   :  { %v1622_v25 = vadd.f32 %v1593_v5, %v648_v24  ;;  %v918_v28 = vpop.f32.mrb[5].mxu1  ;;  %760 = vrot.lane.b32.xlu1 %v1108_v21, %s1154_s2  ;;  %v903_v29 = vpop.f32.mrb[9].mxu0  ;;  %v1629_v16 = vadd.f32 %v1593_v5, %v623_v22 }
 0x21b   :  { %v676_v3 = vsub.f32 0.0, %v1622_v25  ;;  %v671_v37 = vsub.f32 0.0, %v1629_v16 }
 0x21d   :  { %v698_v33 = vmul.f32 1.442695, %v676_v3  ;;  %v688_v7 = vmul.f32 1.442695, %v671_v37 }
 0x21e   :  { %v1110_v34 = vpop.eup %1109 }
 0x21f   :  { %1115 = vpow2.f32 %v698_v33  ;;  %774 = vrot.lane.b32.xlu0 %v1110_v34, %s1154_s2  ;;  %v1112_v35 = vpop.eup %1111 }
 0x220   :  { %v1114_v36 = vpop.eup %1113 }
 0x221   :  { %v709_v27 = vadd.f32 1.0, %v1114_v36 }
 0x223   :  { %762 = vrot.lane.b32.xlu0 %v1112_v35, %s1154_s2 }
 0x229   :  { %v1116_v38 = vpop.eup %1115 }
 0x22a   :  { %v715_v39 = vadd.f32 1.0, %v1116_v38 }
 0x22b   :  { %v628_v40 = vpop.f32.mrb[10].mxu0  ;;  %v653_v23 = vpop.f32.mrb[6].mxu1 }
 0x22c   :  { %v1633_v41 = vadd.f32 %v1593_v5, %v628_v40  ;;  %v1636_v31 = vadd.f32 %v1593_v5, %v653_v23  ;;  %v906_v42 = vpop.f32.mrb[11].mxu0  ;;  %v921_v17 = vpop.f32.mrb[7].mxu1  ;;  %1117 = vrcp.f32 %v715_v39 }
 0x22d   :  { %1119 = vrcp.f32 %v709_v27 }
 0x22e   :  { %v672_v48 = vsub.f32 0.0, %v1633_v41  ;;  %v677_v14 = vsub.f32 0.0, %v1636_v31  ;;  %1121 = vpow2.f32 %v688_v7 }
 0x230   :  { %v690_v49 = vmul.f32 1.442695, %v672_v48  ;;  %v700_v51 = vmul.f32 1.442695, %v677_v14 }
 0x232   :  { %1123 = vpow2.f32 %v690_v49 }
 0x233   :  { %1125 = vpow2.f32 %v700_v51 }
 0x236   :  { %v1118_v52 = vpop.eup %1117 }
 0x237   :  { %776 = vrot.lane.b32.xlu1 %v1118_v52, %s1154_s2  ;;  %v1120_v56 = vpop.eup %1119 }
 0x238   :  { %v1122_v63 = vpop.eup %1121 }
 0x239   :  { %v658_v55 = vpop.f32.mrb[8].mxu1  ;;  %v710_v2 = vadd.f32 1.0, %v1122_v63 }
 0x23a   :  { %v1642_v54 = vadd.f32 %v1593_v5, %v658_v55  ;;  %v924_v62 = vpop.f32.mrb[9].mxu1 }
 0x23b   :  { %764 = vrot.lane.b32.xlu1 %v1120_v56, %s1154_s2 }
 0x23c   :  { %v1124_v11 = vpop.eup %1123  ;;  %v678_v15 = vsub.f32 0.0, %v1642_v54 }
 0x23d   :  { %v1126_v43 = vpop.eup %1125  ;;  %v711_v44 = vadd.f32 1.0, %v1124_v11 }
 0x23e   :  { %v716_v46 = vadd.f32 1.0, %v1126_v43  ;;  %v702_v26 = vmul.f32 1.442695, %v678_v15 }
 0x23f   :  { %1127 = vrcp.f32 %v711_v44 }
 0x240   :  { %1129 = vrcp.f32 %v716_v46 }
 0x241   :  { %1131 = vpow2.f32 %v702_v26  ;;  %v633_v4 = vpop.f32.mrb[12].mxu0  ;;  %v663_v30 = vpop.f32.mrb[10].mxu1 }
 0x242   :  { %v1647_v6 = vadd.f32 %v1593_v5, %v633_v4  ;;  %v1650_v0 = vadd.f32 %v1593_v5, %v663_v30  ;;  %v909_v8 = vpop.f32.mrb[13].mxu0  ;;  %v927_v9 = vpop.f32.mrb[11].mxu1  ;;  %1133 = vrcp.f32 %v710_v2 }
 0x244   :  { %v673_v12 = vsub.f32 0.0, %v1647_v6  ;;  %v679_v13 = vsub.f32 0.0, %v1650_v0 }
 0x246   :  { %v692_v58 = vmul.f32 1.442695, %v673_v12  ;;  %v704_v59 = vmul.f32 1.442695, %v679_v13 }
 0x248   :  { %1135 = vpow2.f32 %v692_v58 }
 0x249   :  { %v1128_v57 = vpop.eup %1127  ;;  %1137 = vpow2.f32 %v704_v59 }
 0x24a   :  { %v1130_v18 = vpop.eup %1129  ;;  %768 = vrot.lane.b32.xlu1 %v1128_v57, %s1154_s2 }
 0x24b   :  { %v1132_v60 = vpop.eup %1131  ;;  %778 = vrot.lane.b32.xlu0 %v1130_v18, %s1154_s2 }
 0x24c   :  { %v717_v5 = vadd.f32 1.0, %v1132_v60  ;;  %v1134_v61 = vpop.eup %1133 }
 0x24e   :  { %1139 = vrcp.f32 %v717_v5 }
 0x24f   :  { %766 = vrot.lane.b32.xlu0 %v1134_v61, %s1154_s2 }
 0x252   :  { %v1136_v10 = vpop.eup %1135 }
 0x253   :  { %v1138_v20 = vpop.eup %1137  ;;  %v712_v21 = vadd.f32 1.0, %v1136_v10 }
 0x254   :  { %v718_v22 = vadd.f32 1.0, %v1138_v20 }
 0x255   :  { %1141 = vrcp.f32 %v712_v21 }
 0x256   :  { %1143 = vrcp.f32 %v718_v22 }
 0x258   :  { %v1140_v24 = vpop.eup %1139 }
 0x259   :  { %780 = vrot.lane.b32.xlu1 %v1140_v24, %s1154_s2 }
 0x25f   :  { %v1142_v28 = vpop.eup %1141 }
 0x260   :  { %770 = vrot.lane.b32.xlu0 %v1142_v28, %s1154_s2  ;;  %v1144_v29 = vpop.eup %1143 }
 0x264   :  { %782 = vrot.lane.b32.xlu0 %v1144_v29, %s1154_s2 }
 0x282   :  { %v759_v32 = vpop.permute.xlu0 %758 }
 0x283   :  { %v797_v3 = vmul.f32 %v759_v32, %v1596_v45 }
 0x285   :  { %810 = vst.msk [vmem:[%s1729_s4] sm:$0xff] %vm472_vm1, %v797_v3 }
 0x287   :  { %v773_v33 = vpop.permute.xlu1 %772 }
 0x288   :  { %v804_v34 = vmul.f32 %v773_v33, %v1603_v53 }
 0x28a   :  { %817 = vst.msk [vmem:[%s1729_s4 + $0x38] sm:$0xff] %vm472_vm1, %v804_v34 }
 0x28b   :  { %v761_v35 = vpop.permute.xlu1 %760 }
 0x28c   :  { %v798_v36 = vmul.f32 %v761_v35, %v1600_v50 }
 0x28e   :  { %811 = vst.msk [vmem:[%s1729_s4 + $0x8] sm:$0xff] %vm472_vm1, %v798_v36 }
 0x291   :  { %v775_v45 = vpop.permute.xlu0 %774 }
 0x292   :  { %v805_v37 = vmul.f32 %v775_v45, %v1612_v47 }
 0x294   :  { %818 = vst.msk [vmem:[%s1729_s4 + $0x40] sm:$0xff] %vm472_vm1, %v805_v37 }
 0x295   :  { %v763_v53 = vpop.permute.xlu0 %762 }
 0x296   :  { %v799_v38 = vmul.f32 %v763_v53, %v1608_v1 }
 0x298   :  { %812 = vst.msk [vmem:[%s1729_s4 + $0x10] sm:$0xff] %vm472_vm1, %v799_v38 }
 0x2a9   :  { %v777_v50 = vpop.permute.xlu1 %776 }
 0x2aa   :  { %v806_v39 = vmul.f32 %v777_v50, %v1622_v25 }
 0x2ac   :  { %819 = vst.msk [vmem:[%s1729_s4 + $0x48] sm:$0xff] %vm472_vm1, %v806_v39 }
 0x2ad   :  { %v765_v47 = vpop.permute.xlu1 %764 }
 0x2ae   :  { %v800_v40 = vmul.f32 %v765_v47, %v1617_v19 }
 0x2b0   :  { %813 = vst.msk [vmem:[%s1729_s4 + $0x18] sm:$0xff] %vm472_vm1, %v800_v40 }
 0x2bc   :  { %v769_v1 = vpop.permute.xlu1 %768 }
 0x2bd   :  { %v779_v23 = vpop.permute.xlu0 %778  ;;  %v802_v27 = vmul.f32 %v769_v1, %v1633_v41 }
 0x2be   :  { %v807_v42 = vmul.f32 %v779_v23, %v1636_v31 }
 0x2bf   :  { %815 = vst.msk [vmem:[%s1729_s4 + $0x28] sm:$0xff] %vm472_vm1, %v802_v27 }
 0x2c0   :  { %820 = vst.msk [vmem:[%s1729_s4 + $0x50] sm:$0xff] %vm472_vm1, %v807_v42 }
 0x2c1   :  { %v767_v19 = vpop.permute.xlu0 %766 }
 0x2c2   :  { %v801_v25 = vmul.f32 %v767_v19, %v1629_v16 }
 0x2c4   :  { %814 = vst.msk [vmem:[%s1729_s4 + $0x20] sm:$0xff] %vm472_vm1, %v801_v25 }
 0x2cb   :  { %v781_v41 = vpop.permute.xlu1 %780 }
 0x2cc   :  { %v808_v31 = vmul.f32 %v781_v41, %v1642_v54 }
 0x2ce   :  { %821 = vst.msk [vmem:[%s1729_s4 + $0x58] sm:$0xff] %vm472_vm1, %v808_v31 }
 0x2d2   :  { %v771_v17 = vpop.permute.xlu0 %770 }
 0x2d3   :  { %v803_v7 = vmul.f32 %v771_v17, %v1647_v6 }
 0x2d5   :  { %816 = vst.msk [vmem:[%s1729_s4 + $0x30] sm:$0xff] %vm472_vm1, %v803_v7 }
 0x2d6   :  { %v783_v16 = vpop.permute.xlu0 %782 }
 0x2d7   :  { %v809_v48 = vmul.f32 %v783_v16, %v1650_v0 }
 0x2d9   :  { %822 = vst.msk [vmem:[%s1729_s4 + $0x60] sm:$0xff] %vm472_vm1, %v809_v48 }

</bundles_post_ra>
